<compile_context>
chip_gen: v6e
topology: v6e:2x2x1
jax: 0.10.0
libtpu: 0.0.40
codegen_flags: <defaults>
</compile_context>

<pallas_src>
import jax
import jax.numpy as jnp
from jax.experimental import pallas as pl
from jax.experimental.pallas import tpu as pltpu


def _standardize_kernel(scale_ref, bias_ref, x_ref, o_ref):
    # scale_ref / bias_ref: SMEM (C,) float32, indexed by the channel grid axis.
    # x_ref / o_ref:        VMEM (1, 1, R, L) blocks (sublane- and lane-dense).
    c = pl.program_id(1)
    scale = scale_ref[c]
    bias = bias_ref[c]
    x = x_ref[...].astype(jnp.float32)
    o_ref[...] = (x * scale + bias).astype(o_ref.dtype)


def _choose_tiling(hw: int, n: int, c: int, itemsize: int):
    """Pick (L, R, hw_pad, rows): lane width, row tile, padded plane size, rows.

    Guarantees: L multiple of 128, rows multiple of 8, R multiple of 8 dividing
    rows, tile bytes ~<= 1 MiB (f32), and (where the input size allows) enough
    grid steps (~16) for pipelining / megacore sharding.
    """
    L = 512 if hw >= 8 * 512 else 128
    unit = 8 * L                                      # smallest dense (8, L) tile
    hw_pad = pl.cdiv(hw, unit) * unit
    rows = hw_pad // L                                # multiple of 8, >= 8
    # Cap from VMEM budget (~1 MiB useful data per block).
    r_cap_bytes = max(8, ((1 << 20) // (L * itemsize)) // 8 * 8)
    # Cap so the grid has >= ~16 total steps when the plane is big enough.
    want_row_tiles = min(max(1, -(-16 // (n * c))), rows // 8)
    r_cap_steps = max(8, (rows // want_row_tiles) // 8 * 8)
    cap = min(r_cap_bytes, r_cap_steps, rows)
    # Largest multiple-of-8 divisor of rows not exceeding the cap.
    best = 8
    r = 8
    while r <= cap:
        if rows % r == 0:
            best = r
        r += 8
    return L, best, hw_pad, rows


def standardize(x: jnp.ndarray, means: jnp.ndarray, stds: jnp.ndarray) -> jnp.ndarray:
    """x: (N, 3, H, W) float array. means/stds: (1, 3, 1, 1) float32 (as in the nn.Module)."""
    N, C, H, W = x.shape
    assert C == 3, "Standardize expects 3 channels (means/stds are length-3)"
    assert jnp.issubdtype(x.dtype, jnp.floating), "Standardize expects a float input"

    hw = H * W
    itemsize = jnp.dtype(x.dtype).itemsize
    L, R, hw_pad, rows = _choose_tiling(hw, N, C, itemsize)

    # Per-channel FMA constants: y = x * scale + bias  ==  (x - mean) / std.
    mean = means.reshape(C).astype(jnp.float32)
    std = stds.reshape(C).astype(jnp.float32)
    scale = 1.0 / std
    bias = -mean / std

    x_flat = x.reshape(N, C, hw)
    if hw_pad != hw:
        x_flat = jnp.pad(x_flat, ((0, 0), (0, 0), (0, hw_pad - hw)))
    x_tiled = x_flat.reshape(N, C, rows, L)

    out_tiled = pl.pallas_call(
        _standardize_kernel,
        out_shape=jax.ShapeDtypeStruct((N, C, rows, L), x.dtype),
        grid_spec=pl.GridSpec(
            grid=(N, C, rows // R),
            in_specs=[
                pl.BlockSpec(memory_space=pltpu.MemorySpace.SMEM),   # scale (C,)
                pl.BlockSpec(memory_space=pltpu.MemorySpace.SMEM),   # bias  (C,)
                pl.BlockSpec((1, 1, R, L), lambda n, c, t: (n, c, t, 0)),
            ],
            out_specs=pl.BlockSpec((1, 1, R, L), lambda n, c, t: (n, c, t, 0)),
        ),
        compiler_params=pltpu.CompilerParams(
            dimension_semantics=("parallel", "parallel", "parallel"),
        ),
    )(scale, bias, x_tiled)

    out = out_tiled.reshape(N, C, hw_pad)
    if hw_pad != hw:
        out = out[:, :, :hw]
    # TODO(synk): fold mean/std into the consumer conv's weights/bias (or fuse this
    # op into that conv) to delete this pure-bandwidth pass from the hot path.
    return out.reshape(N, C, H, W)


if __name__ == "__main__":
    # Deterministic parameters (module __init__ takes means/stds lists of len 3).
    means = jnp.array([0.485, 0.456, 0.406], dtype=jnp.float32).reshape((1, 3, 1, 1))
    stds = jnp.array([0.229, 0.224, 0.225], dtype=jnp.float32).reshape((1, 3, 1, 1))

    key = jax.random.PRNGKey(0)
    x = jax.random.normal(key, (2, 3, 16, 16), dtype=jnp.float32)

    out = jax.block_until_ready(standardize(x, means, stds))
    ref = (x - means) / stds
    assert out.shape == x.shape and out.dtype == x.dtype
    assert jnp.allclose(out, ref, atol=1e-5, rtol=1e-5)

    # Ragged-plane path (H*W not a multiple of the dense tile): exercises padding.
    x2 = jax.random.normal(jax.random.PRNGKey(0), (1, 3, 20, 28), dtype=jnp.float32)
    out2 = jax.block_until_ready(standardize(x2, means, stds))
    ref2 = (x2 - means) / stds
    assert jnp.allclose(out2, ref2, atol=1e-5, rtol=1e-5)

    print("KERNEL_OK")
</pallas_src>

<mosaic_0001>
module attributes {stable_mosaic.version = 11 : i64} {
  func.func @_standardize_kernel(%arg0: i32, %arg1: i32, %arg2: i32, %arg3: memref<3xf32, #tpu.memory_space<smem>>, %arg4: memref<3xf32, #tpu.memory_space<smem>>, %arg5: memref<1x1x8x128xf32, #tpu.memory_space<vmem>>, %arg6: memref<1x1x8x128xf32, #tpu.memory_space<vmem>>) attributes {dimension_semantics = [#tpu.dimension_semantics<parallel>, #tpu.dimension_semantics<parallel>, #tpu.dimension_semantics<parallel>], iteration_bounds = array<i64: 2, 3, 1>, scalar_prefetch = 0 : i64, scratch_operands = 0 : i64, tpu.core_type = #tpu.core_type<tc>, window_params = [{transform_indices = @transform_0, window_bounds = array<i64: 3>}, {transform_indices = @transform_1, window_bounds = array<i64: 3>}, {transform_indices = @transform_2, window_bounds = array<i64: 1, 1, 8, 128>}, {transform_indices = @transform_3, window_bounds = array<i64: 1, 1, 8, 128>}]} {
    %0 = arith.index_cast %arg1 : i32 to index
    %1 = memref.load %arg3[%0] : memref<3xf32, #tpu.memory_space<smem>>
    %2 = arith.index_cast %arg1 : i32 to index
    %3 = memref.load %arg4[%2] : memref<3xf32, #tpu.memory_space<smem>>
    %c0 = arith.constant 0 : index
    %c0_0 = arith.constant 0 : index
    %c0_1 = arith.constant 0 : index
    %c0_2 = arith.constant 0 : index
    %4 = vector.load %arg5[%c0, %c0_0, %c0_1, %c0_2] : memref<1x1x8x128xf32, #tpu.memory_space<vmem>>, vector<1x1x8x128xf32>
    %5 = vector.broadcast %1 : f32 to vector<1x1x8x128xf32>
    %6 = arith.mulf %4, %5 : vector<1x1x8x128xf32>
    %7 = vector.broadcast %3 : f32 to vector<1x1x8x128xf32>
    %8 = arith.addf %6, %7 : vector<1x1x8x128xf32>
    %c0_3 = arith.constant 0 : index
    %c0_4 = arith.constant 0 : index
    %c0_5 = arith.constant 0 : index
    %c0_6 = arith.constant 0 : index
    %9 = vector.load %arg6[%c0_3, %c0_4, %c0_5, %c0_6] : memref<1x1x8x128xf32, #tpu.memory_space<vmem>>, vector<1x1x8x128xf32>
    tpu.vector_store %arg6[%c0_3, %c0_4, %c0_5, %c0_6], %8 {strides = array<i32>} : memref<1x1x8x128xf32, #tpu.memory_space<vmem>>, vector<1x1x8x128xf32>,
    return
  }
  func.func @transform_0(%arg0: i32, %arg1: i32, %arg2: i32) -> i32 {
    %c0_i32 = arith.constant 0 : i32
    %c0_i32_0 = arith.constant 0 : i32
    return %c0_i32 : i32
  }
  func.func @transform_1(%arg0: i32, %arg1: i32, %arg2: i32) -> i32 {
    %c0_i32 = arith.constant 0 : i32
    %c0_i32_0 = arith.constant 0 : i32
    return %c0_i32 : i32
  }
  func.func @transform_2(%arg0: i32, %arg1: i32, %arg2: i32) -> (i32, i32, i32, i32) {
    %c0_i32 = arith.constant 0 : i32
    %c0_i32_0 = arith.constant 0 : i32
    return %arg0, %arg1, %arg2, %c0_i32 : i32, i32, i32, i32
  }
  func.func @transform_3(%arg0: i32, %arg1: i32, %arg2: i32) -> (i32, i32, i32, i32) {
    %c0_i32 = arith.constant 0 : i32
    %c0_i32_0 = arith.constant 0 : i32
    return %arg0, %arg1, %arg2, %c0_i32 : i32, i32, i32, i32
  }
}

</mosaic_0001>

<bundles_post_ra>
// kernel: tpu_custom_call.1
= control target key start
LH: loop header
LB: loop body
LE: loop exit
PB: predicated region body
PF: predicated region fallthrough
CT: control target
= control target key end

     0   :  { %s890_s0 = inlined_call_operand.hbm [shape: f32[3], index: 0, kind: input, shape index: {}]   ;;  %s891_s1 = inlined_call_operand.vmem [shape: f32[3], index: 1, kind: input, shape index: {}]   ;;  %s892_s2 = inlined_call_operand.hbm [shape: f32[2,3,8,128], index: 2, kind: input, shape index: {}]   ;;  %s893_s3 = inlined_call_operand.hbm [shape: f32[2,3,8,128], index: 3, kind: output, shape index: {}]  }
   0x1   :  { %896 = sst [smem:[#allocation16_spill]] %s890_s0 }
   0x2   :  { %897 = sst [smem:[#allocation17_spill]] %s891_s1 }
   0x3   :  { %8 = vsyncpa [#allocation5], 0 }
   0x4   :  { %9 = vsyncpa [#allocation6], 0 }
   0x5   :  { %10 = vsyncpa [#allocation3], 0 }
   0x6   :  { %12 = vsyncpa [#allocation3 + $0x1], 0 }
   0x7   :  { %13 = vsyncpa [#allocation4], 0 }
   0x8   :  { %15 = vsyncpa [#allocation4 + $0x1], 0  ;;  %s682_s12 = smov 0   ;;  %s684_s13 = smov 0  }
   0x9   :  { %s686_s14 = smov 0   ;;  %s688_s15 = smov 0  }
   0xa   :  { %s690_s16 = smov 0   ;;  %s692_s17 = smov 0  }
   0xb   :  { %s694_s18 = smov 0   ;;  %s696_s19 = smov 0  }
   0xc LB: > { %s380_s20 = sadd.s32 4294967295, %s656_s19   ;;  %s381_s21 = sadd.s32 4294967294, %s656_s19   ;;  %s656_s19 = sphi %s696_s19, %s21_s19   ;;  %s652_s18 = sphi %s694_s18, %s919_s18   ;;  %s648_s17 = sphi %s692_s17, %s918_s17   ;;  %s644_s16 = sphi %s690_s16, %s917_s16   ;;  %s640_s15 = sphi %s688_s15, %s916_s15   ;;  %s636_s14 = sphi %s686_s14, %s915_s14   ;;  %s632_s13 = sphi %s684_s13, %s914_s13   ;;  %s628_s12 = sphi %s682_s12, %s913_s12  }
   0xd   : > { %p106_p0 = scmp.ne.s32.totalorder %s632_s13, %s628_s12  ;;  %p726_p1 = scmp.eq.s32.totalorder %s380_s20, 0 }
   0xe   : > { %p730_p2 = scmp.eq.s32.totalorder %s380_s20, 5  ;;  %p140_p3 = scmp.eq.s32.totalorder %s381_s21, 5 }
   0xf   : > { %p736_p4 = por %p726_p1, %p106_p0  ;;  %p382_p5 = scmp.ge.s32.totalorder %s656_s19, 1 }
  0x10   : > { %p741_p6 = por %p140_p3, %p106_p0  ;;  %p147_p7 = scmp.lt.s32.totalorder %s656_s19, 7 }
  0x11   : > { %s904_s1 = sld [smem:[#allocation17_spill]]  ;;  %s658_s4 = smov [#allocation2]  }
  0x12   : > { %s901_s25 = scalar_select %p741_p6, 1, 0 }
  0x13   : > { %p746_p8 = pnand %p382_p5, %p147_p7  ;;  %s906_s0 = sld [smem:[#allocation16_spill]] }
  0x14   : > { %902 = sst [smem:[#allocation14_spill]] %s901_s25 }
  0x15   : > { %p411_p9 = pneg %p746_p8 }
  0x17   : > { %s169_s29 = sshll.u32 %s904_s1, 4  ;;  %p757_p10 = pnand %p411_p9, %p726_p1  ;;  %s170_s29 = int_to_ptr.vmem [resolvable:$true] %s169_s29 }
  0x18   : > { %s509_s7 = scalar_lea.vmem %s170_s29, 16  ;;  %p517_p3 = scmp.lt.s32.totalorder %s170_s29, %s170_s29 }
  0x19   : > { %414 = dma.hbm_to_smem (!%p757_p10), %s906_s0, 16, %s658_s4, [#allocation5]  }
  0x1a   : > { %p510_p11 = scmp.ne.s32.totalorder %s170_s29, %s509_s7  ;;  %p511_p12 = pneg %p757_p10 }
  0x1b   : > { %p518_p5 = scmp.lt.s32.totalorder %s509_s7, %s509_s7 }
  0x1c   : > { %p512_p13 = pnand %p511_p12, %p510_p11 }
  0x1d   : > { %p519_p7 = por %p518_p5, %p517_p3 }
  0x1e   : > { %p513_p0 = pneg %p512_p13 }
  0x20   : > { %p520_p9 = pnand %p519_p7, %p513_p0 }
  0x22   : > { %523 = shalt.err (!%p520_p9)
}
  0x23   : > { %s659_s8 = smov [#allocation7]   ;;  %s36_s9 = sadd.s32 1, %s648_s17 }
  0x24   : > { %417 = dma.vmem_to_smem (!%p757_p10), %s170_s29, 16, %s659_s8, [#allocation6]  }
  0x25   : > { %s40_s10 = sadd.s32 1, %s652_s18  ;;  %p38_p11 = scmp.ge.s32.totalorder %s36_s9, 3 }
  0x26   : > { %s93_s11 = sadd.s32 1, %s636_s14  ;;  %p100_p12 = scmp.ne.s32.totalorder %s636_s14, %s632_s13 }
  0x27   : > { %p101_p13 = scmp.eq.s32.totalorder %s656_s19, 0  ;;  %s921_s9 = smov (%p38_p11, %s36_s9), 0 }
  0x28   : > { %907 = sst [smem:[#allocation15_spill]] %s921_s9  ;;  %s923_s10 = smov (!%p38_p11, %s40_s10), %s652_s18 }
  0x29   : > { %s87_s20 = ssub.s32 %s648_s17, %s921_s9  ;;  %p781_p0 = por %p101_p13, %p100_p12 }
  0x2a   : > { %p42_p10 = scmp.ge.s32.totalorder %s923_s10, 2  ;;  %p787_p3 = por %p730_p2, %p100_p12 }
  0x2b   : > { %p428_p5 = scmp.lt.s32.totalorder %s656_s19, 6  ;;  %s180_s28 = sand.u32 1, %s636_s14  }
  0x2c   : > { %s925_s10 = smov (%p42_p10, %s923_s10), 0  ;;  %s386_s29 = sshll.u32 %s180_s28, 3 }
  0x2d   : > { %s86_s30 = ssub.s32 %s652_s18, %s925_s10  ;;  %s397_s5 = smul.u32 3, %s652_s18 }
  0x2e   : > { %s88_s4 = sor.u32 %s87_s20, %s86_s30  ;;  %s184_s6 = scalar_lea.vmem [#allocation8], %s386_s29 }
  0x2f   : > { %p91_p7 = scmp.eq.s32.totalorder %s88_s4, 0  ;;  %s194_s7 = sshll.u32 %s184_s6, 4  ;;  %s195_s7 = int_to_ptr.vmem [resolvable:$true] %s194_s7 }
  0x30   : > { %s190_s8 = sadd.s32 %s648_s17, %s397_s5  ;;  %p806_p2 = pnand %p428_p5, %p781_p0 }
  0x31   : > { %s800_s23 = scalar_select %p91_p7, %s636_s14, %s93_s11  }
  0x32   : > { %s387_s0 = sshll.u32 %s190_s8, 7  ;;  %s181_s30 = scalar_lea.sflag [#allocation3], %s180_s28 }
  0x33   : > { %s192_s20 = scalar_lea.hbm %s892_s2, %s387_s0  ;;  %p526_p9 = pneg %p806_p2 }
  0x34   : > { %s537_s29 = scalar_lea.vmem %s195_s7, 128  ;;  %s660_s11 = smov [#allocation8]  }
  0x35   : > { %p538_p11 = scmp.ne.s32.totalorder %s195_s7, %s537_s29  ;;  %s542_s4 = sshll.u32 %s660_s11, 4  ;;  %s543_s4 = int_to_ptr.vmem [resolvable:$false] %s542_s4 }
  0x36   : > { %s544_s21 = scalar_lea.vmem %s543_s4, 256  ;;  %p545_p0 = scmp.lt.s32.totalorder %s195_s7, %s543_s4 }
  0x37   : > { %p540_p12 = pnand %p538_p11, %p526_p9  ;;  %p546_p10 = scmp.lt.s32.totalorder %s544_s21, %s537_s29 }
  0x39   : > { %p541_p13 = pneg %p540_p12  ;;  %p547_p5 = por %p546_p10, %p545_p0 }
  0x3b   : > { %p548_p7 = pnand %p547_p5, %p541_p13 }
  0x3d   : > { %551 = shalt.err (!%p548_p7)
}
  0x3e   : > { %421 = dma.hbm_to_vmem [thread:$0]  (!%p806_p2), %s192_s20, 128, %s195_s7, %s181_s30  }
  0x3f   : > { %203 = sbr.rel (%p746_p8) target bundleno = 103 (0x67), region = 32 }
  0x44   : > { %611 = dma.done.wait (%p726_p1), [#allocation5], 16  }
  0x45   : > { %613 = vsyncadd (%p726_p1), [#allocation5], 4294967280 }
  0x46   : > { %615 = dma.done.wait (%p726_p1), [#allocation6], 16  }
  0x47   : > { %617 = vsyncadd (%p726_p1), [#allocation6], 4294967280  ;;  %s828_s0 = sand.u32 1, %s632_s13  }
  0x48   : > { %s391_s1 = sshll.u32 %s828_s0, 3  ;;  %s214_s25 = scalar_lea.sflag [#allocation3], %s828_s0 }
  0x49   : > { %s217_s26 = scalar_lea.vmem [#allocation8], %s391_s1 }
  0x4a   : > { %619 = dma.done.wait (%p736_p4), %s214_s25, 128  }
  0x4b   : > { %621 = vsyncadd (%p736_p4), %s214_s25, 4294967168 }
  0x4c   : > { %222 = sfence }
  0x4d   : > { %s241_s22 = sld [smem:[#allocation2 + %s640_s15]]  ;;  %s398_s28 = smul.u32 3, %s644_s16  ;;  %v243_v0 = vld [vmem:[%s217_s26] sm:$0xff] }
  0x4e   : > { %s242_s9 = sld [smem:[#allocation7 + %s640_s15]]  ;;  %s240_s5 = scalar_lea.vmem [#allocation9], %s391_s1 }
  0x4f   : > { %s266_s6 = sshll.u32 %s240_s5, 4  ;;  %s262_s7 = sadd.s32 %s640_s15, %s398_s28  ;;  %s840_s6 = int_to_ptr.vmem [resolvable:$true] %s266_s6 }
  0x50   : > { %s394_s8 = sshll.u32 %s262_s7, 7  ;;  %s250_s16 = scalar_lea.sflag [#allocation4], %s828_s0 }
  0x51   : > { %s264_s30 = scalar_lea.hbm %s893_s3, %s394_s8  ;;  %s552_s29 = scalar_lea.vmem %s840_s6, 128 }
  0x52   : > { %p553_p1 = scmp.ne.s32.totalorder %s840_s6, %s552_s29  ;;  %s661_s15 = smov [#allocation9]  }
  0x53   : > { %v244_v1 = vstv %s241_s22  ;;  %s556_s11 = sshll.u32 %s661_s15, 4  ;;  %s557_s11 = int_to_ptr.vmem [resolvable:$false] %s556_s11 }
  0x54   : > { %v245_v2 = vmul.f32 %v244_v1, %v243_v0  ;;  %v246_v3 = vstv %s242_s9  ;;  %p554_p4 = pnand %p553_p1, %p787_p3  ;;  %s558_s4 = scalar_lea.vmem %s557_s11, 256 }
  0x55   : > { %p559_p2 = scmp.lt.s32.totalorder %s840_s6, %s557_s11  ;;  %p560_p9 = scmp.lt.s32.totalorder %s558_s4, %s552_s29 }
  0x56   : > { %v247_v4 = vadd.f32 %v246_v3, %v245_v2  ;;  %p555_p8 = pneg %p554_p4 }
  0x57   : > { %p561_p11 = por %p560_p9, %p559_p2 }
  0x58   : > { %248 = vst [vmem:[%s240_s5] sm:$0xff] %v247_v4 }
  0x59   : > { %p562_p12 = pnand %p561_p11, %p555_p8 }
  0x5b   : > { %565 = shalt.err (!%p562_p12)
}
  0x5c   : > { %s566_s21 = scalar_lea.hbm %s264_s30, 128  ;;  %s570_s25 = scalar_lea.hbm %s893_s3, 768 }
  0x5d   : > { %p567_p13 = scmp.ne.s32.totalorder %s264_s30, %s566_s21  ;;  %p571_p5 = scmp.lt.s32.totalorder %s264_s30, %s893_s3 }
  0x5e   : > { %p572_p7 = scmp.lt.s32.totalorder %s570_s25, %s566_s21 }
  0x5f   : > { %p568_p0 = pnand %p567_p13, %p787_p3 }
  0x60   : > { %p573_p1 = por %p572_p7, %p571_p5 }
  0x61   : > { %p569_p10 = pneg %p568_p0 }
  0x63   : > { %p574_p4 = pnand %p573_p1, %p569_p10 }
  0x65   : > { %577 = shalt.err (!%p574_p4)
}
  0x66   : > { %409 = dma.vmem_to_hbm [thread:$0]  (%p787_p3), %s840_s6, 128, %s264_s30, %s250_s16  }
  0x67 PF: > { %p431_p8 = scmp.ge.s32.totalorder %s656_s19, 2  ;;  %s278_s28 = sand.u32 1, %s628_s12  }
  0x68   : > { %s279_s5 = scalar_lea.sflag [#allocation4], %s278_s28 }
  0x69   : > { %p423_p2 = pnand %p431_p8, %p741_p6 }
  0x6b   : > { %p424_p9 = pneg %p423_p2 }
  0x6d   : > { %623 = dma.done.wait (%p424_p9), %s279_s5, 128  }
  0x6e   : > { %625 = vsyncadd (%p424_p9), %s279_s5, 4294967168  ;;  %s21_s19 = sadd.s32 1, %s656_s19   ;;  %s912_s27 = sld [smem:[#allocation15_spill]] }
  0x6f   : > { %p18_p11 = scmp.ge.s32.totalorder %s21_s19, 8   ;;  %s913_s12 = smov %s632_s13 }
  0x70   : > { %s914_s13 = smov %s636_s14  ;;  %s915_s14 = smov %s800_s23 }
  0x71   : > { %s916_s15 = smov %s648_s17  ;;  %s917_s16 = smov %s652_s18 }
  0x72   : > { %s919_s18 = smov %s925_s10  ;;  %20 = sbr.rel (!%p18_p11) target bundleno = 12 (0xc), region = 87 }
  0x74   : > { %s918_s17 = smov %s912_s27 }
  0x77   :  { %284 = vsyncpa [#allocation3], 1 }
  0x78   :  { %286 = vsyncpa [#allocation3 + $0x1], 1 }
  0x79   :  { %287 = vsyncpa [#allocation4], 1 }
  0x7a   :  { %289 = vsyncpa [#allocation4 + $0x1], 1 }
  0x7b   :  { %290 = vsyncpa [#allocation5], 1 }
  0x7c   :  { %292 = vsyncpa [#allocation5 + $0x1], 1 }
  0x7d   :  { %293 = vsyncpa [#allocation6], 1 }
  0x7e   :  { %295 = vsyncpa [#allocation6 + $0x1], 1 }

</bundles_post_ra>
